<compile_context>
chip_gen: v5e
topology: v5e:2x2
jax: 0.10.0
libtpu: 0.0.40
codegen_flags: <defaults>
</compile_context>

<pallas_src>
import jax
import jax.numpy as jnp
from jax.experimental import pallas as pl
from jax.experimental.pallas import tpu as pltpu


def _round_up(v: int, m: int) -> int:
    return ((v + m - 1) // m) * m


def _cls_head_kernel(cls_ref, w_ref, b_ref, out_ref):
    """One batch tile per grid step.

    cls_ref: (Bt, E)     cls-token rows for this batch tile
    w_ref:   (E, Cpad)   linear weight, pre-transposed + zero-padded (resident)
    b_ref:   (1, Cpad)   linear bias, f32, zero-padded (resident)
    out_ref: (Bt, Cpad)  logits (lane-dense padded width)
    """
    acc = jnp.dot(cls_ref[...], w_ref[...], preferred_element_type=jnp.float32)
    out_ref[...] = (acc + b_ref[...]).astype(out_ref.dtype)


def classification_head(x, weight, bias, *, block_b=None):
    """Pallas implementation of ClassificationHead.forward.

    x:      (B, T, E)  token embeddings; only the cls token (index 0) is used
    weight: (C, E)     nn.Linear weight (PyTorch layout)
    bias:   (C,)       nn.Linear bias
    returns (B, C)     logits, in x.dtype
    """
    b, _, e = x.shape
    c = weight.shape[0]
    assert weight.shape == (c, e), "weight must be (n_classes, emb_size)"
    assert bias.shape == (c,), "bias must be (n_classes,)"

    # ---- wrapper-side layout plumbing (tiny; touches B*E + E*Cpad elems) ----
    cls = x[:, 0, :]                      # (B, E); fused into the call below
    c_pad = _round_up(max(c, 1), 128)     # lane-dense class width
    w_t = weight.T                        # (E, C)
    if c_pad != c:
        w_t = jnp.pad(w_t, ((0, 0), (0, c_pad - c)))           # zero-filled cols
        b2 = jnp.pad(bias.astype(jnp.float32), (0, c_pad - c))
    else:
        b2 = bias.astype(jnp.float32)
    b2 = b2.reshape(1, c_pad)

    in_itemsize = jnp.dtype(x.dtype).itemsize
    out_itemsize = in_itemsize
    sublane = {1: 32, 2: 16}.get(in_itemsize, 8)  # packing-aware row multiple

    # ---- bytes-aware batch tile selection -----------------------------------
    if block_b is None:
        budget = 40 * 1024 * 1024                       # safe on v5e/v6e/v7x
        resident = 2 * e * c_pad * in_itemsize + 2 * c_pad * 4   # weight + bias
        per_row = (2 * e * in_itemsize          # cls, double-buffered
                   + 2 * c_pad * out_itemsize   # out, double-buffered
                   + c_pad * 4)                 # f32 accumulator headroom
        avail = max(budget - resident, per_row * sublane)
        block_b = max(sublane, (avail // per_row) // sublane * sublane)
        block_b = min(block_b, 1024)            # ~roofline already at 512-1024
        # Give both v7x TensorCores work: at least 2 grid steps when possible.
        if b > sublane:
            block_b = min(block_b, _round_up(pl.cdiv(b, 2), sublane))
    if block_b >= b:
        block_b = b                              # single full-batch block

    grid = (pl.cdiv(b, block_b),)

    # Explicit scoped-VMEM limit sized from actual usage (with headroom).
    vmem_bytes = (2 * block_b * e * in_itemsize
                  + 2 * block_b * c_pad * out_itemsize
                  + 2 * e * c_pad * in_itemsize
                  + 2 * c_pad * 4
                  + block_b * c_pad * 4)
    vmem_limit = max(32 * 1024 * 1024,
                     min(int(vmem_bytes * 1.5) + (2 << 20), 56 * 1024 * 1024))

    out_padded = pl.pallas_call(
        _cls_head_kernel,
        out_shape=jax.ShapeDtypeStruct((b, c_pad), x.dtype),
        grid_spec=pltpu.PrefetchScalarGridSpec(
            num_scalar_prefetch=0,
            grid=grid,
            in_specs=[
                pl.BlockSpec((block_b, e), lambda i: (i, 0)),   # cls rows (tiled)
                pl.BlockSpec((e, c_pad), lambda i: (0, 0)),     # weight (resident)
                pl.BlockSpec((1, c_pad), lambda i: (0, 0)),     # bias (resident)
            ],
            out_specs=pl.BlockSpec((block_b, c_pad), lambda i: (i, 0)),
        ),
        compiler_params=pltpu.CompilerParams(
            # Independent batch tiles -> both v7x TensorCores can stream;
            # harmless no-op on single-TC v5e/v6e.
            dimension_semantics=("parallel",),
            vmem_limit_bytes=vmem_limit,
            # Let XLA fuse the x[:, 0, :] slice into this call's first operand
            # so the cls rows are read straight from x (no extra HBM round-trip).
            allow_input_fusion=[True, False, False],
        ),
    )(cls, w_t, b2)

    # Drop the zero-padded classes before anything downstream (softmax/argmax).
    return out_padded[:, :c]


if __name__ == "__main__":
    # Small shapes consistent with the module: (batch, seq, emb) -> (batch, n_classes).
    B, T, E, C = 2, 8, 32, 3

    key = jax.random.PRNGKey(0)
    k1, k2, k3 = jax.random.split(key, 3)
    x = jax.random.normal(k1, (B, T, E), dtype=jnp.float32)
    weight = jax.random.normal(k2, (C, E), dtype=jnp.float32) * (1.0 / jnp.sqrt(E))
    bias = jax.random.normal(k3, (C,), dtype=jnp.float32)

    out = classification_head(x, weight, bias)
    out = jax.block_until_ready(out)

    # Plain-JAX reference: linear(x[:, 0]).
    ref = x[:, 0, :] @ weight.T + bias[None, :]
    assert out.shape == (B, C)
    assert jnp.allclose(out, ref, atol=1e-5, rtol=1e-5), "Pallas output mismatch vs reference"

    print("KERNEL_OK")
</pallas_src>

<mosaic_0001>
module attributes {stable_mosaic.version = 11 : i64} {
  func.func @_cls_head_kernel(%arg0: i32, %arg1: memref<2x32xf32, #tpu.memory_space<vmem>>, %arg2: memref<32x128xf32, #tpu.memory_space<vmem>>, %arg3: memref<1x128xf32, #tpu.memory_space<vmem>>, %arg4: memref<2x128xf32, #tpu.memory_space<vmem>>) attributes {dimension_semantics = [#tpu.dimension_semantics<parallel>], iteration_bounds = array<i64: 1>, scalar_prefetch = 0 : i64, scratch_operands = 0 : i64, tpu.core_type = #tpu.core_type<tc>, window_params = [{transform_indices = @transform_0, window_bounds = array<i64: 2, 32>}, {pipeline_mode = #tpu.pipeline_mode<synchronous>, transform_indices = @transform_1, window_bounds = array<i64: 32, 128>}, {pipeline_mode = #tpu.pipeline_mode<synchronous>, transform_indices = @transform_2, window_bounds = array<i64: 1, 128>}, {transform_indices = @transform_3, window_bounds = array<i64: 2, 128>}]} {
    %c0 = arith.constant 0 : index
    %c0_0 = arith.constant 0 : index
    %0 = vector.load %arg1[%c0, %c0_0] : memref<2x32xf32, #tpu.memory_space<vmem>>, vector<2x32xf32>
    %c0_1 = arith.constant 0 : index
    %c0_2 = arith.constant 0 : index
    %1 = vector.load %arg2[%c0_1, %c0_2] : memref<32x128xf32, #tpu.memory_space<vmem>>, vector<32x128xf32>
    %cst = arith.constant dense<0.000000e+00> : vector<2x128xf32>
    %2 = tpu.matmul %0, %1, %cst {dimension_numbers = #tpu.dot_dimension_numbers<[1], [0], [0], [1], [0, 0, 1, 1], [], []>} : vector<2x32xf32>, vector<32x128xf32>, vector<2x128xf32> -> vector<2x128xf32>
    %c0_3 = arith.constant 0 : index
    %c0_4 = arith.constant 0 : index
    %3 = vector.load %arg3[%c0_3, %c0_4] : memref<1x128xf32, #tpu.memory_space<vmem>>, vector<1x128xf32>
    %4 = vector.broadcast %3 : vector<1x128xf32> to vector<2x128xf32>
    %5 = arith.addf %2, %4 : vector<2x128xf32>
    %c0_5 = arith.constant 0 : index
    %c0_6 = arith.constant 0 : index
    %6 = vector.load %arg4[%c0_5, %c0_6] : memref<2x128xf32, #tpu.memory_space<vmem>>, vector<2x128xf32>
    tpu.vector_store %arg4[%c0_5, %c0_6], %5 {strides = array<i32>} : memref<2x128xf32, #tpu.memory_space<vmem>>, vector<2x128xf32>,
    return
  }
  func.func @transform_0(%arg0: i32) -> (i32, i32) {
    %c0_i32 = arith.constant 0 : i32
    %c0_i32_0 = arith.constant 0 : i32
    return %arg0, %c0_i32 : i32, i32
  }
  func.func @transform_1(%arg0: i32) -> (i32, i32) {
    %c0_i32 = arith.constant 0 : i32
    %c0_i32_0 = arith.constant 0 : i32
    %c0_i32_1 = arith.constant 0 : i32
    return %c0_i32, %c0_i32_0 : i32, i32
  }
  func.func @transform_2(%arg0: i32) -> (i32, i32) {
    %c0_i32 = arith.constant 0 : i32
    %c0_i32_0 = arith.constant 0 : i32
    %c0_i32_1 = arith.constant 0 : i32
    return %c0_i32, %c0_i32_0 : i32, i32
  }
  func.func @transform_3(%arg0: i32) -> (i32, i32) {
    %c0_i32 = arith.constant 0 : i32
    %c0_i32_0 = arith.constant 0 : i32
    return %arg0, %c0_i32 : i32, i32
  }
}

</mosaic_0001>

<bundles_post_ra>
// kernel: tpu_custom_call.1
= control target key start
LH: loop header
LB: loop body
LE: loop exit
PB: predicated region body
PF: predicated region fallthrough
CT: control target
= control target key end

     0   :  { %8 = vsyncpa [#allocation3], 0  ;;  %s219_s0 = inlined_call_operand.hbm [shape: f32[2,32], index: 0, kind: input, shape index: {}]   ;;  %s220_s1 = inlined_call_operand.hbm [shape: f32[32,128], index: 1, kind: input, shape index: {}]   ;;  %s221_s2 = inlined_call_operand.vmem [shape: f32[1,128], index: 2, kind: input, shape index: {}]   ;;  %s222_s3 = inlined_call_operand.hbm [shape: f32[2,128], index: 3, kind: output, shape index: {}]  }
   0x1   :  { %9 = vsyncpa [#allocation6], 0 }
   0x2   :  { %10 = vsyncpa [#allocation4], 0  ;;  %s16_s14 = sshll.u32 %s219_s0, 4  ;;  %s182_s15 = smov [#allocation2]   ;;  %s17_s14 = int_to_ptr.hbm [resolvable:$true] %s16_s14 }
   0x3   :  { %s18_s16 = sshll.u32 %s182_s15, 4  ;;  %s26_s19 = sshll.u32 %s220_s1, 4  ;;  %s19_s16 = int_to_ptr.vmem [resolvable:$true] %s18_s16  ;;  %s27_s19 = int_to_ptr.hbm [resolvable:$true] %s26_s19 }
   0x4   :  { %21 = dma.hbm_to_vmem [thread:$0]  %s17_s14, 32, %s19_s16, [#allocation3]  }
   0x5   :  { %s183_s20 = smov [#allocation5]   ;;  %s184_s22 = smov 128  }
   0x6   :  { %s28_s21 = sshll.u32 %s183_s20, 4  ;;  %s185_s23 = smov 8   ;;  %s29_s21 = int_to_ptr.vmem [resolvable:$true] %s28_s21 }
   0x7   :  { %34 = dma.hbm_to_vmem [thread:$0]  %s27_s19, 512, %s29_s21, [#allocation6], %s184_s22, %s184_s22, %s185_s23  }
   0x8   :  { %176 = dma.done.wait [#allocation3], 32  }
   0x9   :  { %177 = vsyncadd [#allocation3], 4294967264 }
   0xa   :  { %178 = dma.done.wait [#allocation6], 512  }
   0xb   :  { %179 = vsyncadd [#allocation6], 4294966784  ;;  %v49_v0 = vld [vmem:[#allocation5 + $0x18] sm:$0xff]  ;;  %v48_v1 = vld [vmem:[#allocation5 + $0x10] sm:$0xff]  ;;  %vm54_vm0 = vcmask 261120   ;;  %s186_s24 = smov [#allocation7]  }
   0xc   :  { %70 = vmatpush.msra.mxu0 %v49_v0  ;;  %v47_v2 = vld [vmem:[#allocation5 + $0x8] sm:$0xff]  ;;  %v46_v3 = vld [vmem:[#allocation5] sm:$0xff]  ;;  %v45_v4 = vld [vmem:[#allocation2] sm:$0x3]  ;;  %s84_s25 = sshll.u32 %s186_s24, 4  ;;  %s86_s28 = sshll.u32 %s222_s3, 4  ;;  %s85_s25 = int_to_ptr.vmem [resolvable:$true] %s84_s25  ;;  %s87_s28 = int_to_ptr.hbm [resolvable:$true] %s86_s28 }
   0xd   :  { %v103_v5 = vld [vmem:[%s221_s2] ss:$0 sm:$0xff] }
   0xe   :  { %71 = vmatpush.msra.mxu0 %v48_v1 }
  0x10   :  { %72 = vmatpush.msra.mxu0 %v47_v2 }
  0x12   :  { %73 = vmatpush.msra.mxu0 %v46_v3 }
  0x13   :  { %97 = vmatmul.msk.f32.vlgmr.msra.gmra.mxu0 %vm54_vm0, %v45_v4 }
  0x90   :  { %v75_v6 = vpop.f32.mrf.mxu0 }
  0x91   :  { %v76_v7 = vadd.f32 %v103_v5, %v75_v6 }
  0x93   :  { %78 = vst [vmem:[#allocation7] sm:$0x3] %v76_v7 }
  0x94   :  { %89 = dma.vmem_to_hbm [thread:$0]  %s85_s25, 32, %s87_s28, [#allocation4]  }
  0x95   :  { %180 = dma.done.wait [#allocation4], 32  }
  0x96   :  { %181 = vsyncadd [#allocation4], 4294967264 }
  0x97   :  { %94 = vsyncpa [#allocation3], 1 }
  0x98   :  { %95 = vsyncpa [#allocation6], 1 }
  0x99   :  { %96 = vsyncpa [#allocation4], 1 }

</bundles_post_ra>
